<compile_context>
chip_gen: v7x
topology: tpu7x:2x2x1
jax: 0.10.0
libtpu: 0.0.40
codegen_flags: <defaults>
</compile_context>

<pallas_src>
import math

import jax
import jax.numpy as jnp
from jax.experimental import pallas as pl
from jax.experimental.pallas import tpu as pltpu

_LANES = 128
_SUBLANES = 8


def _bcast_fill_kernel(pat_ref, out_ref):
    # pat_ref: (1, *inner) pre-scaled pattern tile (VMEM-resident, constant block index).
    # out_ref: (tb, *inner) output tile.  Pure leading-axis broadcast + store: the store
    # slot is the only active vector slot, which is all a mem-bound fill needs.
    out_ref[...] = jnp.broadcast_to(pat_ref[...], out_ref.shape)


def _choose_tile(n, row_bytes, align, budget_bytes):
    """Pick the leading-dim block size for an n-row output (row_bytes bytes per row).

    Preferences:
      (a) the tile fits the per-buffer VMEM byte budget (output is double-buffered),
      (b) the tile is a multiple of `align` (sublane constraint; a tile equal to the full
          extent n is always legal),
      (c) at least two grid steps so v7x's two TensorCores both participate,
      (d) the tile divides n evenly (no masked partial last block) unless that would shrink
          the tile by more than 4x.
    """
    if n <= align:
        return n
    cap = max(align, (budget_bytes // max(row_bytes, 1)) // align * align)
    # Target >= 2 blocks: tile at most ceil(n/2), rounded up to `align`.
    half = -(-n // 2)
    half = -(-half // align) * align
    cap = max(align, min(cap, half))
    # Largest multiple of `align` <= cap that divides n evenly (trace-time Python only).
    t = cap
    while t >= align:
        if n % t == 0:
            break
        t -= align
    if t >= align and n % t == 0 and t * 4 >= cap:
        return t
    return cap  # accept a partial (masked) last block rather than tiny tiles


def zero_instruction_encoder(x, table, sizes=None, *,
                             tile_budget_bytes=4 * 1024 * 1024,
                             min_pallas_bytes=128 * 1024,
                             force_pallas=False):
    """Pallas equivalent of ZeroInstructionEncoder.forward.

    `x` contributes only its shape (its values are zeroed by the reference forward), so it
    is never passed to / read by the kernel.  `sizes` is accepted to match the torch
    signature but unused (torch sums over the full seq axis regardless).
    """
    # TODO(synk): the in-place `x.fill_(0)` side effect cannot be propagated to the caller
    # (JAX arrays are immutable); only the returned embedding is reproduced.  Also,
    # S * row is not bit-identical to torch's S-term float summation (it is well within
    # 1e-6 relative tolerance), which we accept.
    B, S = x.shape
    V, D = table.shape
    assert V == 1, "ZeroInstructionEncoder uses nn.Embedding(1, out_size)"

    row = table[0].astype(jnp.float32) * jnp.float32(S)  # (D,) scaled embedding row

    out_bytes = B * D * 4
    if out_bytes < min_pallas_bytes and not force_pallas:
        # Tiny result: plain XLA broadcast is strictly cheaper than the fixed pallas_call
        # setup cost and can fuse into the consumer (no extra HBM round trip).
        return jnp.broadcast_to(row, (B, D))

    # ---- choose a lane-dense view of the row-major (B, D) output --------------------
    if D % _LANES == 0:
        # Already lane-dense: broadcast the (1, D) scaled row over batch rows.
        view_shape = (B, D)
        pattern = row.reshape(1, D)
        align = _SUBLANES
    elif (B * D) % _LANES == 0:
        rows = (B * D) // _LANES
        period = math.lcm(D, _LANES) // _LANES  # pattern period in 128-lane rows
        if period == 1:
            # D divides 128: view output as (B*D/128, 128); pattern = row tiled across
            # lanes ONCE in the wrapper (hoisted out of the per-step body).
            view_shape = (rows, _LANES)
            pattern = jnp.tile(row, _LANES // D).reshape(1, _LANES)
            align = _SUBLANES
        else:
            g = math.lcm(period, _SUBLANES)  # sublane-aligned pattern height
            if rows % g == 0:
                # Lane-periodic pattern (e.g. D=96,48,192): view output as (rows/g, g, 128)
                # so the kernel only broadcasts along the leading axis — no lane shuffles,
                # no in-kernel reshapes, still unmasked 128-lane stores.
                view_shape = (rows // g, g, _LANES)
                pattern = jnp.tile(row, (g * _LANES) // D).reshape(1, g, _LANES)
                align = 1
            else:
                view_shape = (B, D)  # small/awkward: plain row view (masked stores)
                pattern = row.reshape(1, D)
                align = _SUBLANES
    else:
        # Awkward width: masked partial stores on the last lane group (unavoidable).
        view_shape = (B, D)
        pattern = row.reshape(1, D)
        align = _SUBLANES

    n = view_shape[0]
    inner = view_shape[1:]
    row_bytes = 4 * math.prod(inner)
    tb = _choose_tile(n, row_bytes, align, tile_budget_bytes)
    grid = (pl.cdiv(n, tb),)

    zeros = (0,) * len(inner)
    out = pl.pallas_call(
        _bcast_fill_kernel,
        out_shape=jax.ShapeDtypeStruct(view_shape, jnp.float32),
        grid_spec=pltpu.PrefetchScalarGridSpec(
            num_scalar_prefetch=0,
            grid=grid,
            # Pattern stays VMEM-resident (constant block index); it is tiny.
            in_specs=[pl.BlockSpec((1,) + inner, lambda i: (0,) + zeros)],
            out_specs=pl.BlockSpec((tb,) + inner, lambda i: (i,) + zeros),
        ),
        compiler_params=pltpu.CompilerParams(
            # v7x: the two TensorCores split the output fill; no-op on v5e/v6e.
            dimension_semantics=("parallel",),
        ),
    )(pattern)

    return out.reshape(B, D)


if __name__ == "__main__":
    key = jax.random.PRNGKey(0)
    k1, k2, k3 = jax.random.split(key, 3)

    # --- small shapes consistent with the module: batch=2, seq=8, out_size=32 --------
    B, S, OUT_DIM = 2, 8, 32
    x = jnp.zeros((B, S), dtype=jnp.int32)  # values irrelevant: forward zeroes them
    sizes = jnp.full((B,), S, dtype=jnp.int32)
    # nn.Embedding(1, out, padding_idx=0) zero-inits its single row; use a random row so
    # the correctness check is non-trivial for arbitrary weights.
    table = jax.random.normal(k1, (1, OUT_DIM), dtype=jnp.float32)

    out = jax.block_until_ready(
        zero_instruction_encoder(x, table, sizes, force_pallas=True))
    ref = jnp.broadcast_to(jnp.float32(S) * table[0], (B, OUT_DIM))
    assert out.shape == (B, OUT_DIM), out.shape
    assert out.dtype == jnp.float32, out.dtype
    assert jnp.allclose(out, ref, rtol=1e-6, atol=1e-6), "mismatch (small/forced path)"

    # --- packed lane-dense path with a multi-block grid (D | 128) --------------------
    B2, S2 = 4096, 64
    x2 = jnp.zeros((B2, S2), dtype=jnp.int32)
    out2 = jax.block_until_ready(
        zero_instruction_encoder(x2, table, jnp.full((B2,), S2, jnp.int32)))
    ref2 = jnp.broadcast_to(jnp.float32(S2) * table[0], (B2, OUT_DIM))
    assert out2.shape == (B2, OUT_DIM), out2.shape
    assert jnp.allclose(out2, ref2, rtol=1e-6, atol=1e-6), "mismatch (packed path)"

    # --- lane-periodic packed path (128 % D != 0 but B*D % 128 == 0) -----------------
    B3, S3, D3 = 64, 8, 96
    table3 = jax.random.normal(k2, (1, D3), dtype=jnp.float32)
    x3 = jnp.zeros((B3, S3), dtype=jnp.int32)
    out3 = jax.block_until_ready(
        zero_instruction_encoder(x3, table3, jnp.full((B3,), S3, jnp.int32),
                                 force_pallas=True))
    ref3 = jnp.broadcast_to(jnp.float32(S3) * table3[0], (B3, D3))
    assert out3.shape == (B3, D3), out3.shape
    assert jnp.allclose(out3, ref3, rtol=1e-6, atol=1e-6), "mismatch (periodic path)"

    # --- wide lane-dense path (D % 128 == 0) ------------------------------------------
    B4, S4, D4 = 256, 16, 256
    table4 = jax.random.normal(k3, (1, D4), dtype=jnp.float32)
    x4 = jnp.zeros((B4, S4), dtype=jnp.int32)
    out4 = jax.block_until_ready(
        zero_instruction_encoder(x4, table4, jnp.full((B4,), S4, jnp.int32)))
    ref4 = jnp.broadcast_to(jnp.float32(S4) * table4[0], (B4, D4))
    assert out4.shape == (B4, D4), out4.shape
    assert jnp.allclose(out4, ref4, rtol=1e-6, atol=1e-6), "mismatch (wide path)"

    print("KERNEL_OK")
</pallas_src>

<mosaic_0001>
module attributes {stable_mosaic.version = 11 : i64} {
  func.func @_bcast_fill_kernel(%arg0: i32, %arg1: memref<1x32xf32, #tpu.memory_space<vmem>>, %arg2: memref<2x32xf32, #tpu.memory_space<vmem>>) attributes {dimension_semantics = [#tpu.dimension_semantics<parallel>], iteration_bounds = array<i64: 1>, scalar_prefetch = 0 : i64, scratch_operands = 0 : i64, tpu.core_type = #tpu.core_type<tc>, window_params = [{pipeline_mode = #tpu.pipeline_mode<synchronous>, transform_indices = @transform_0, window_bounds = array<i64: 1, 32>}, {transform_indices = @transform_1, window_bounds = array<i64: 2, 32>}]} {
    %c0 = arith.constant 0 : index
    %c0_0 = arith.constant 0 : index
    %0 = vector.load %arg1[%c0, %c0_0] : memref<1x32xf32, #tpu.memory_space<vmem>>, vector<1x32xf32>
    %1 = vector.shape_cast %0 : vector<1x32xf32> to vector<1x32xf32>
    %2 = vector.broadcast %1 : vector<1x32xf32> to vector<2x32xf32>
    %c0_1 = arith.constant 0 : index
    %c0_2 = arith.constant 0 : index
    %3 = vector.load %arg2[%c0_1, %c0_2] : memref<2x32xf32, #tpu.memory_space<vmem>>, vector<2x32xf32>
    tpu.vector_store %arg2[%c0_1, %c0_2], %2 {strides = array<i32>} : memref<2x32xf32, #tpu.memory_space<vmem>>, vector<2x32xf32>,
    return
  }
  func.func @transform_0(%arg0: i32) -> (i32, i32) {
    %c0_i32 = arith.constant 0 : i32
    %c0_i32_0 = arith.constant 0 : i32
    %c0_i32_1 = arith.constant 0 : i32
    return %c0_i32, %c0_i32_0 : i32, i32
  }
  func.func @transform_1(%arg0: i32) -> (i32, i32) {
    %c0_i32 = arith.constant 0 : i32
    %c0_i32_0 = arith.constant 0 : i32
    return %arg0, %c0_i32 : i32, i32
  }
}

</mosaic_0001>

<bundles_post_ra>
// kernel: tpu_custom_call.1
= control target key start
LH: loop header
LB: loop body
LE: loop exit
PB: predicated region body
PF: predicated region fallthrough
CT: control target
= control target key end

     0   :  { %6 = vsyncpa [#allocation3], 0  ;;  %s132_s0 = inlined_call_operand.hbm [shape: f32[1,32], index: 0, kind: input, shape index: {}]   ;;  %s133_s1 = inlined_call_operand.hbm [shape: f32[2,32], index: 1, kind: output, shape index: {}]  }
   0x1   :  { %7 = vsyncpa [#allocation4], 0  ;;  %s96_s6 = smov [#allocation2]   ;;  %s48_s10 = scalar_lea.hbm %s132_s0, 16 }
   0x2   :  { %s14_s7 = sshll.u32 %s96_s6, 4  ;;  %p49_p0 = scmp.ne.s32.totalorder %s132_s0, %s48_s10  ;;  %s15_s7 = int_to_ptr.vmem [resolvable:$true] %s14_s7 }
   0x3   :  { %p52_p1 = scmp.lt.u32.totalorder %s48_s10, %s132_s0 }
   0x5   :  { %p54_p2 = pnand %p52_p1, %p49_p0 }
   0x7   :  { %57 = shalt.err (!%p54_p2)
}
   0x8   :  { %s58_s15 = scalar_lea.vmem %s15_s7, 16  ;;  %s62_s16 = scalar_lea.vmem %s15_s7, 32 }
   0x9   :  { %p59_p3 = scmp.ne.s32.totalorder %s15_s7, %s58_s15  ;;  %p63_p4 = scmp.lt.s32.totalorder %s15_s7, %s15_s7 }
   0xa   :  { %p64_p5 = scmp.lt.s32.totalorder %s62_s16, %s58_s15 }
   0xc   :  { %p65_p6 = por %p64_p5, %p63_p4 }
   0xe   :  { %p66_p7 = pnand %p65_p6, %p59_p3 }
  0x10   :  { %69 = shalt.err (!%p66_p7)
}
  0x11   :  { %17 = dma.hbm_to_vmem [thread:$0]  %s132_s0, 16, %s15_s7, [#allocation3]  }
  0x12   :  { %92 = dma.done.wait [#allocation3], 16  }
  0x13   :  { %93 = vsyncadd [#allocation3], 4294967280  ;;  %s97_s19 = smov [#allocation5]   ;;  %vm28_vm0 = vcmask 254976   ;;  %v45_v0 = vld [vmem:[#allocation2] ss:$0 sm:$0xff] }
  0x14   :  { %s36_s20 = sshll.u32 %s97_s19, 4  ;;  %29 = vst.msk [vmem:[#allocation5] sm:$0x3] %vm28_vm0, %v45_v0  ;;  %s37_s20 = int_to_ptr.vmem [resolvable:$true] %s36_s20 }
  0x15   :  { %s70_s21 = scalar_lea.vmem %s37_s20, 32  ;;  %p75_p9 = scmp.lt.s32.totalorder %s37_s20, %s37_s20 }
  0x16   :  { %p71_p8 = scmp.ne.s32.totalorder %s37_s20, %s70_s21  ;;  %p76_p10 = scmp.lt.s32.totalorder %s70_s21, %s70_s21 }
  0x18   :  { %p77_p11 = por %p76_p10, %p75_p9 }
  0x1a   :  { %p78_p12 = pnand %p77_p11, %p71_p8 }
  0x1c   :  { %81 = shalt.err (!%p78_p12)
}
  0x1d   :  { %s82_s24 = scalar_lea.hbm %s133_s1, 32 }
  0x1e   :  { %p83_p13 = scmp.ne.s32.totalorder %s133_s1, %s82_s24  ;;  %p86_p0 = scmp.lt.u32.totalorder %s82_s24, %s133_s1 }
  0x20   :  { %p88_p1 = pnand %p86_p0, %p83_p13 }
  0x22   :  { %91 = shalt.err (!%p88_p1)
}
  0x23   :  { %39 = dma.vmem_to_hbm [thread:$0]  %s37_s20, 32, %s133_s1, [#allocation4]  }
  0x24   :  { %94 = dma.done.wait [#allocation4], 32  }
  0x25   :  { %95 = vsyncadd [#allocation4], 4294967264 }
  0x26   :  { %43 = vsyncpa [#allocation3], 1 }
  0x27   :  { %44 = vsyncpa [#allocation4], 1 }

</bundles_post_ra>
